<compile_context>
chip_gen: v6e
topology: v6e:2x2x1
jax: 0.10.0
libtpu: 0.0.40
codegen_flags: <defaults>
</compile_context>

<pallas_src>
import jax
import jax.numpy as jnp
from jax.experimental import pallas as pl
from jax.experimental.pallas import tpu as pltpu


def _round_up(n: int, m: int) -> int:
    return ((n + m - 1) // m) * m


def _cdiv(a: int, b: int) -> int:
    return (a + b - 1) // b


def _classifier_kernel(x_ref, w_ref, b_ref, o_ref):
    # x_ref: (TB, D_in) bf16, w_ref: (D_in, D_out_pad) bf16,
    # b_ref: (1, D_out_pad) f32, o_ref: (TB, D_out_pad) out dtype.
    # bf16 operands feed the MXU; accumulation and softmax math in f32.
    logits = jnp.dot(
        x_ref[...], w_ref[...], preferred_element_type=jnp.float32
    ) + b_ref[...]

    # Numerically-stable softmax over the feature axis (dim=1), all f32.
    m = jnp.max(logits, axis=1, keepdims=True)
    e = jnp.exp(logits - m)
    denom = jnp.sum(e, axis=1, keepdims=True)
    # Exact reciprocal on the EUP slot (one per row -> negligible cost).
    o_ref[...] = (e * pl.reciprocal(denom, approx=False)).astype(o_ref.dtype)


def classifier_forward(x, weight, bias, *, block_b: int = 512):
    """x: (B, D_in); weight: (D_out, D_in); bias: (D_out,) -> (B, D_out)."""
    B, D_in = x.shape
    D_out = weight.shape[0]
    out_dtype = x.dtype

    # ---- Lane-dense output: pad D_out to a multiple of 128. ----
    D_out_pad = _round_up(D_out, 128)
    pad_cols = D_out_pad - D_out
    if pad_cols:
        # Padded weight rows are zero; padded bias lanes are very negative so
        # exp(padded_logit - max) == 0 and they never affect the denominator.
        weight = jnp.pad(weight, ((0, pad_cols), (0, 0)))
        bias = jnp.pad(bias, (0, pad_cols), constant_values=-1e30)

    # One-time HBM transpose to (D_in, D_out_pad) + bf16 cast: the kernel then
    # runs a plain (M,K)x(K,N) contraction with no in-kernel weight transpose.
    w_t = jnp.asarray(weight.T, dtype=jnp.bfloat16)
    b2 = jnp.asarray(bias, dtype=jnp.float32).reshape(1, D_out_pad)
    x_bf = x.astype(jnp.bfloat16)

    # ---- Balanced batch tiling (>= 2 tiles for v7x 2-TC sharding). ----
    num_tiles = max(2, _cdiv(B, block_b))
    TB = max(8, _round_up(_cdiv(B, num_tiles), 8))
    B_pad = _round_up(B, TB)
    if B_pad != B:
        x_bf = jnp.pad(x_bf, ((0, B_pad - B), (0, 0)))
    grid = (B_pad // TB,)

    # ---- Explicit VMEM budget: single-buffered W/bias + double-buffered
    # x (bf16) and out (f32) tiles, plus headroom. ----
    vmem_bytes = (
        D_in * D_out_pad * 2          # resident bf16 weight (Buffered(1))
        + D_out_pad * 4               # resident f32 bias   (Buffered(1))
        + 2 * TB * D_in * 2           # double-buffered bf16 x tiles
        + 2 * TB * D_out_pad * 4      # double-buffered f32 out tiles
    )
    vmem_limit = min(max(int(1.5 * vmem_bytes) + (2 << 20), 32 << 20), 96 << 20)

    cost = pl.CostEstimate(
        flops=2 * B_pad * D_in * D_out_pad,
        transcendentals=B_pad * D_out_pad,
        bytes_accessed=(
            2 * B_pad * D_in            # x (bf16)
            + 2 * D_in * D_out_pad      # weight (bf16)
            + 4 * D_out_pad             # bias (f32)
            + 4 * B_pad * D_out_pad     # output (f32)
        ),
    )

    out_padded = pl.pallas_call(
        _classifier_kernel,
        out_shape=jax.ShapeDtypeStruct((B_pad, D_out_pad), out_dtype),
        grid=grid,
        in_specs=[
            # Batch-tiled activations: auto-pipelined (double-buffered).
            pl.BlockSpec((TB, D_in), lambda i: (i, 0)),
            # Constant index_map -> fetched once; single-buffered to halve the
            # largest VMEM allocation.
            pl.BlockSpec((D_in, D_out_pad), lambda i: (0, 0),
                         pipeline_mode=pl.Buffered(1)),
            pl.BlockSpec((1, D_out_pad), lambda i: (0, 0),
                         pipeline_mode=pl.Buffered(1)),
        ],
        out_specs=pl.BlockSpec((TB, D_out_pad), lambda i: (i, 0)),
        compiler_params=pltpu.CompilerParams(
            dimension_semantics=("parallel",),
            vmem_limit_bytes=vmem_limit,
        ),
        cost_estimate=cost,
    )(x_bf, w_t, b2)

    # Strip batch padding and padded softmax lanes (their probabilities are
    # exactly 0, so the real columns are correctly normalized).
    return out_padded[:B, :D_out]


if __name__ == "__main__":
    key = jax.random.PRNGKey(0)
    k_x, k_w, k_b = jax.random.split(key, 3)

    batch = 8
    input_dimension = 32
    output_dimension = 16

    # Deterministic synthetic parameters (same shapes/roles as nn.Linear).
    x = jax.random.normal(k_x, (batch, input_dimension), dtype=jnp.float32)
    weight = jax.random.normal(
        k_w, (output_dimension, input_dimension), dtype=jnp.float32
    ) * 0.1
    bias = jax.random.normal(k_b, (output_dimension,), dtype=jnp.float32) * 0.1

    out = classifier_forward(x, weight, bias)
    out = jax.block_until_ready(out)

    # Sanity check against pure-JAX f32 reference (kernel uses bf16 MXU
    # operands, so allow a modest tolerance on the probabilities).
    ref = jax.nn.softmax(x @ weight.T + bias, axis=1)
    assert out.shape == (batch, output_dimension)
    assert jnp.allclose(out, ref, atol=2e-2, rtol=2e-2)
    # Exact reciprocal -> rows are normalized to ~f32 precision.
    assert jnp.allclose(jnp.sum(out, axis=1), 1.0, atol=1e-3)

    print("KERNEL_OK")
</pallas_src>

<mosaic_0001>
module attributes {stable_mosaic.version = 11 : i64} {
  func.func @_classifier_kernel(%arg0: i32, %arg1: memref<8x32xbf16, #tpu.memory_space<vmem>>, %arg2: memref<32x128xbf16, #tpu.memory_space<vmem>>, %arg3: memref<1x128xf32, #tpu.memory_space<vmem>>, %arg4: memref<8x128xf32, #tpu.memory_space<vmem>>) attributes {dimension_semantics = [#tpu.dimension_semantics<parallel>], iteration_bounds = array<i64: 1>, scalar_prefetch = 0 : i64, scratch_operands = 0 : i64, tpu.core_type = #tpu.core_type<tc>, window_params = [{transform_indices = @transform_0, window_bounds = array<i64: 8, 32>}, {pipeline_mode = #tpu.pipeline_mode<synchronous>, transform_indices = @transform_1, window_bounds = array<i64: 32, 128>}, {pipeline_mode = #tpu.pipeline_mode<synchronous>, transform_indices = @transform_2, window_bounds = array<i64: 1, 128>}, {transform_indices = @transform_3, window_bounds = array<i64: 8, 128>}]} {
    %c0 = arith.constant 0 : index
    %c0_0 = arith.constant 0 : index
    %0 = vector.load %arg1[%c0, %c0_0] : memref<8x32xbf16, #tpu.memory_space<vmem>>, vector<8x32xbf16>
    %c0_1 = arith.constant 0 : index
    %c0_2 = arith.constant 0 : index
    %1 = vector.load %arg2[%c0_1, %c0_2] : memref<32x128xbf16, #tpu.memory_space<vmem>>, vector<32x128xbf16>
    %cst = arith.constant dense<0.000000e+00> : vector<8x128xf32>
    %2 = tpu.matmul %0, %1, %cst {dimension_numbers = #tpu.dot_dimension_numbers<[1], [0], [0], [1], [0, 0, 1, 1], [], []>} : vector<8x32xbf16>, vector<32x128xbf16>, vector<8x128xf32> -> vector<8x128xf32>
    %c0_3 = arith.constant 0 : index
    %c0_4 = arith.constant 0 : index
    %3 = vector.load %arg3[%c0_3, %c0_4] : memref<1x128xf32, #tpu.memory_space<vmem>>, vector<1x128xf32>
    %4 = vector.broadcast %3 : vector<1x128xf32> to vector<8x128xf32>
    %5 = arith.addf %2, %4 : vector<8x128xf32>
    %cst_5 = arith.constant dense<0xFF800000> : vector<8xf32>
    %6 = vector.multi_reduction <maximumf>, %5, %cst_5 [1] : vector<8x128xf32> to vector<8xf32>
    %7 = vector.shape_cast %6 : vector<8xf32> to vector<8x1xf32>
    %8 = vector.broadcast %7 : vector<8x1xf32> to vector<8x128xf32>
    %9 = arith.subf %5, %8 : vector<8x128xf32>
    %10 = math.exp %9 : vector<8x128xf32>
    %cst_6 = arith.constant dense<0.000000e+00> : vector<8xf32>
    %11 = vector.multi_reduction <add>, %10, %cst_6 [1] : vector<8x128xf32> to vector<8xf32>
    %12 = vector.shape_cast %11 : vector<8xf32> to vector<8x1xf32>
    %13 = tpu.reciprocal %12 : vector<8x1xf32> -> vector<8x1xf32>
    %14 = vector.broadcast %13 : vector<8x1xf32> to vector<8x128xf32>
    %15 = arith.mulf %10, %14 : vector<8x128xf32>
    %c0_7 = arith.constant 0 : index
    %c0_8 = arith.constant 0 : index
    %16 = vector.load %arg4[%c0_7, %c0_8] : memref<8x128xf32, #tpu.memory_space<vmem>>, vector<8x128xf32>
    tpu.vector_store %arg4[%c0_7, %c0_8], %15 {strides = array<i32>} : memref<8x128xf32, #tpu.memory_space<vmem>>, vector<8x128xf32>,
    return
  }
  func.func @transform_0(%arg0: i32) -> (i32, i32) {
    %c0_i32 = arith.constant 0 : i32
    %c0_i32_0 = arith.constant 0 : i32
    return %arg0, %c0_i32 : i32, i32
  }
  func.func @transform_1(%arg0: i32) -> (i32, i32) {
    %c0_i32 = arith.constant 0 : i32
    %c0_i32_0 = arith.constant 0 : i32
    %c0_i32_1 = arith.constant 0 : i32
    return %c0_i32, %c0_i32_0 : i32, i32
  }
  func.func @transform_2(%arg0: i32) -> (i32, i32) {
    %c0_i32 = arith.constant 0 : i32
    %c0_i32_0 = arith.constant 0 : i32
    %c0_i32_1 = arith.constant 0 : i32
    return %c0_i32, %c0_i32_0 : i32, i32
  }
  func.func @transform_3(%arg0: i32) -> (i32, i32) {
    %c0_i32 = arith.constant 0 : i32
    %c0_i32_0 = arith.constant 0 : i32
    return %arg0, %c0_i32 : i32, i32
  }
}

</mosaic_0001>

<bundles_post_ra>
// kernel: tpu_custom_call.1
= control target key start
LH: loop header
LB: loop body
LE: loop exit
PB: predicated region body
PF: predicated region fallthrough
CT: control target
= control target key end

     0   :  { %8 = vsyncpa [#allocation3], 0  ;;  %s269_s0 = inlined_call_operand.hbm [shape: bf16[8,32], index: 0, kind: input, shape index: {}]   ;;  %s270_s1 = inlined_call_operand.hbm [shape: bf16[32,128], index: 1, kind: input, shape index: {}]   ;;  %s271_s2 = inlined_call_operand.vmem [shape: f32[1,128], index: 2, kind: input, shape index: {}]   ;;  %s272_s3 = inlined_call_operand.hbm [shape: f32[8,128], index: 3, kind: output, shape index: {}]  }
   0x1   :  { %9 = vsyncpa [#allocation6], 0 }
   0x2   :  { %10 = vsyncpa [#allocation4], 0  ;;  %s230_s12 = smov [#allocation2]   ;;  %s231_s14 = smov [#allocation5]  }
   0x3   :  { %s17_s13 = sshll.u32 %s230_s12, 4  ;;  %s26_s15 = sshll.u32 %s231_s14, 4  ;;  %s18_s13 = int_to_ptr.vmem [resolvable:$true] %s17_s13  ;;  %s27_s15 = int_to_ptr.vmem [resolvable:$true] %s26_s15 }
   0x4   :  { %s172_s16 = scalar_lea.vmem %s18_s13, 64  ;;  %p177_p1 = scmp.lt.s32.totalorder %s18_s13, %s18_s13 }
   0x5   :  { %p173_p0 = scmp.ne.s32.totalorder %s18_s13, %s172_s16  ;;  %p178_p2 = scmp.lt.s32.totalorder %s172_s16, %s172_s16 }
   0x7   :  { %p179_p3 = por %p178_p2, %p177_p1 }
   0x9   :  { %p180_p4 = pnand %p179_p3, %p173_p0 }
   0xb   :  { %183 = shalt.err (!%p180_p4)
}
   0xc   :  { %20 = dma.hbm_to_vmem [thread:$0]  %s269_s0, 64, %s18_s13, [#allocation3]  }
   0xd   :  { %s192_s19 = scalar_lea.vmem %s27_s15, 256  ;;  %p197_p6 = scmp.lt.s32.totalorder %s27_s15, %s27_s15 }
   0xe   :  { %p193_p5 = scmp.ne.s32.totalorder %s27_s15, %s192_s19  ;;  %p198_p7 = scmp.lt.s32.totalorder %s192_s19, %s192_s19 }
  0x10   :  { %p199_p8 = por %p198_p7, %p197_p6 }
  0x12   :  { %p200_p9 = pnand %p199_p8, %p193_p5 }
  0x14   :  { %203 = shalt.err (!%p200_p9)
}
  0x15   :  { %s232_s20 = smov 64   ;;  %s233_s21 = smov 4  }
  0x16   :  { %32 = dma.hbm_to_vmem [thread:$0]  %s270_s1, 256, %s27_s15, [#allocation6], %s232_s20, %s232_s20, %s233_s21  }
  0x17   :  { %224 = dma.done.wait [#allocation3], 64  }
  0x18   :  { %225 = vsyncadd [#allocation3], 4294967232 }
  0x19   :  { %226 = dma.done.wait [#allocation6], 256  }
  0x1a   :  { %227 = vsyncadd [#allocation6], 4294967040  ;;  %v234_v0 = vmov 0.0   ;;  %vm235_vm0 = vmmov 0   ;;  %v158_v1 = vld [vmem:[#allocation5 + $0x8] sm:$0xff]   ;;  %v159_v2 = vld [vmem:[#allocation5] sm:$0xff]  }
  0x1b   :  { %143 = vmatprep.subr.bf16.mxu0 %v234_v0  ;;  %147 = vmatprep.mubr.msk.bf16.mxu0 %vm235_vm0, %v234_v0  ;;  %v42_v3 = vld [vmem:[#allocation2] sm:$0xf]  ;;  %vm66_vm1 = vcmask 261120   ;;  %s236_s1 = smov [#allocation7]  }
  0x1c   :  { %144 = vmatpush3.bf16.msra.mxu0 %v158_v1  ;;  %v136_v4 = vld [vmem:[%s271_s2] ss:$0 sm:$0xff]  ;;  %s126_s25 = sshll.u32 %s236_s1, 4  ;;  %s127_s25 = int_to_ptr.vmem [resolvable:$true] %s126_s25 }
  0x1d   :  { %145 = vmatprep.subr.bf16.mxu0 %v234_v0  ;;  %s204_s2 = scalar_lea.vmem %s127_s25, 128  ;;  %p209_p11 = scmp.lt.s32.totalorder %s127_s25, %s127_s25 }
  0x1e   :  { %p205_p10 = scmp.ne.s32.totalorder %s127_s25, %s204_s2  ;;  %p210_p12 = scmp.lt.s32.totalorder %s204_s2, %s204_s2 }
  0x20   :  { %146 = vmatpush3.bf16.msra.mxu0 %v159_v2  ;;  %p211_p13 = por %p210_p12, %p209_p11 }
  0x22   :  { %p212_p0 = pnand %p211_p13, %p205_p10 }
  0x23   :  { %148 = vmatmul.mubr.msk.bf16.vlgmr.msra.gmra.mxu0 %vm66_vm1, %v42_v3 }
  0xe3   :  { %v104_v5 = vpop.f32.mrf.mxu0 }
  0xe4   :  { %v105_v6 = vadd.f32 %v136_v4, %v104_v5 }
  0xe5   :  { %v149_v7 = vpop.f32.mrf.mxu0 }
  0xe6   :  { %110 = vmax.xlane.f32.xlu0 %v105_v6 }
  0xe7   :  { %v107_v8 = vpop.f32.mrf.mxu0 }
  0xe9   :  { %v150_v9 = vpop.f32.mrf.mxu0 }
 0x16f   :  { %v111_v10 = vpop.xlane.xlu0 %110 }
 0x170   :  { %v112_v11 = vsub.f32 %v105_v6, %v111_v10 }
 0x172   :  { %v113_v12 = vmul.f32 1.442695, %v112_v11 }
 0x174   :  { %160 = vpow2.f32 %v113_v12 }
 0x181   :  { %v161_v13 = vpop.eup %160 }
 0x182   :  { %115 = vadd.xlane.f32.xlu0 %v161_v13 }
 0x20b   :  { %v116_v14 = vpop.xlane.xlu0 %115 }
 0x20c   :  { %162 = vrcp.f32 %v116_v14 }
 0x219   :  { %v163_v15 = vpop.eup %162 }
 0x21a   :  { %v118_v16 = vmul.f32 %v163_v15, %v161_v13 }
 0x21c   :  { %119 = vst [vmem:[#allocation7] sm:$0xff] %v118_v16 }
 0x21d   :  { %215 = shalt.err (!%p212_p0)
}
 0x21e   :  { %129 = dma.vmem_to_hbm [thread:$0]  %s127_s25, 128, %s272_s3, [#allocation4]  }
 0x21f   :  { %228 = dma.done.wait [#allocation4], 128  }
 0x220   :  { %229 = vsyncadd [#allocation4], 4294967168 }
 0x221   :  { %133 = vsyncpa [#allocation3], 1 }
 0x222   :  { %134 = vsyncpa [#allocation6], 1 }
 0x223   :  { %135 = vsyncpa [#allocation4], 1 }

</bundles_post_ra>
